<compile_context>
chip_gen: v7x
topology: tpu7x:2x2x1
jax: 0.10.0
libtpu: 0.0.40
codegen_flags: <defaults>
</compile_context>

<pallas_src>
import math

import jax
import jax.numpy as jnp
from jax import lax
from jax.experimental import pallas as pl
from jax.experimental.pallas import tpu as pltpu


def _decoder_kernel(emb_ref, h0_ref, w_in0_ref, w_deep_ref, bias_ref,
                    w_out_ref, b_out_ref, out_ref, state_ref,
                    gi0_scr, htop_scr):
    """Single-invocation decoder.

    emb_ref   : [T*B, E]   time-major rows (row = t*B + b)
    h0_ref    : [L, B, H]
    w_in0_ref : [E, 3H]    layer-0 input weights (gate order r|z|n)
    w_deep_ref: [2L-1,H,3H] = [w_hh_0..w_hh_{L-1}, w_ih_1..w_ih_{L-1}]
    bias_ref  : [L, 4, H]  rows = (b_ih_r+b_hh_r, b_ih_z+b_hh_z, b_ih_n, b_hh_n)
    w_out_ref : [H, O], b_out_ref: [1, O]
    out_ref   : [T*B, O]   time-major output rows
    state_ref : [L, B, H]
    gi0_scr   : [T*B, 3H]  layer-0 projection, time-major
    htop_scr  : [T*B, H]   top-layer hidden, time-major
    """
    TB, E = emb_ref.shape
    L, B, H = h0_ref.shape
    T = TB // B
    f32 = jnp.float32

    # ---- Layer-0 input projection: one fused matmul, one contiguous store. ----
    gi0_scr[...] = jnp.dot(emb_ref[...], w_in0_ref[...],
                           preferred_element_type=f32)

    # ---- Hoist weights / biases (loaded & broadcast once, live in vregs). -----
    w_hh = [w_deep_ref[l] for l in range(L)]                     # [H, 3H] each
    w_ih = [None] + [w_deep_ref[L + l - 1] for l in range(1, L)] # [H, 3H] (l>0)
    b_r, b_z, b_in, b_hn = [], [], [], []
    for l in range(L):
        bl = bias_ref[l]                                         # [4, H]
        b_r.append(jnp.broadcast_to(bl[0:1, :], (B, H)))
        b_z.append(jnp.broadcast_to(bl[1:2, :], (B, H)))
        b_in.append(jnp.broadcast_to(bl[2:3, :], (B, H)))
        b_hn.append(jnp.broadcast_to(bl[3:4, :], (B, H)))

    h0 = [h0_ref[l] for l in range(L)]
    origin = [0.2 * h for h in h0]           # origin_state = 0.2 * h0 (hoisted)

    def step(t, mod):
        """One MyGRU time step. mod = list of per-layer modified states [B,H]."""
        gi0 = gi0_scr[pl.ds(t * B, B), :]                        # [B, 3H]
        x = None
        new_h = []
        for l in range(L):
            h_prev = mod[l]
            gi = gi0 if l == 0 else jnp.dot(x, w_ih[l],
                                            preferred_element_type=f32)
            gh = jnp.dot(h_prev, w_hh[l], preferred_element_type=f32)  # [B,3H]
            r = jax.nn.sigmoid(gi[:, :H] + gh[:, :H] + b_r[l])
            z = jax.nn.sigmoid(gi[:, H:2 * H] + gh[:, H:2 * H] + b_z[l])
            n = jnp.tanh(gi[:, 2 * H:] + b_in[l] + r * (gh[:, 2 * H:] + b_hn[l]))
            x = (1.0 - z) * n + z * h_prev
            new_h.append(x)
        # One contiguous [B, H] time-major store per step (not per batch row).
        htop_scr[pl.ds(t * B, B), :] = x
        return new_h

    # t == 0 peeled: uses the unmodified initial state.
    h = step(0, h0)

    def body(t, carry):
        h_prev = list(carry)
        mod = [origin[l] + 0.8 * h_prev[l] for l in range(L)]
        return tuple(step(t, mod))

    h = list(lax.fori_loop(1, T, body, tuple(h)))

    for l in range(L):                       # final hidden state, written once
        state_ref[l] = h[l]

    # ---- rnn2out head: single fused matmul over the whole sequence. ----------
    out_ref[...] = (jnp.dot(htop_scr[...], w_out_ref[...],
                            preferred_element_type=f32) + b_out_ref[...])


def _pack_params(params, hidden_size):
    """Pack GRU parameters into a handful of operands (one-time, wrapper side).

    Returns (w_in0 [E,3H], w_deep [2L-1,H,3H], biases [L,4,H], w_out, b_out).
    r/z biases are pre-combined (b_ih + b_hh)."""
    H = hidden_size
    L = len(params["w_ih"])
    w_in0 = params["w_ih"][0]                                      # [E, 3H]
    w_deep = jnp.stack(list(params["w_hh"]) + list(params["w_ih"][1:]), axis=0)
    bias_rows = []
    for l in range(L):
        b_ih, b_hh = params["b_ih"][l], params["b_hh"][l]
        bias_rows.append(jnp.concatenate([
            b_ih[:, 0:H] + b_hh[:, 0:H],          # b_r
            b_ih[:, H:2 * H] + b_hh[:, H:2 * H],  # b_z
            b_ih[:, 2 * H:3 * H],                 # b_in
            b_hh[:, 2 * H:3 * H],                 # b_hn
        ], axis=0))                               # [4, H]
    biases = jnp.stack(bias_rows, axis=0)         # [L, 4, H]
    return w_in0, w_deep, biases, params["w_out"], params["b_out"]


def decoder_forward(embeddings, state, lengths, params):
    """embeddings: [B, T, E] f32 (batch-first), state: [L, B, H] f32,
    lengths: [B] (unused by the PyTorch forward, accepted for API parity)."""
    del lengths
    B, T, E = embeddings.shape
    L, _, H = state.shape
    O = params["w_out"].shape[1]

    w_in0, w_deep, biases, w_out, b_out = _pack_params(params, H)

    # Time-major flatten (row = t*B + b): cheap wrapper-side layout change that
    # makes every in-kernel read/write a contiguous block.
    emb_tm = jnp.transpose(embeddings, (1, 0, 2)).reshape(T * B, E)

    in_specs = [
        pl.BlockSpec((T * B, E), lambda i: (0, 0)),        # embeddings (time-major)
        pl.BlockSpec((L, B, H), lambda i: (0, 0, 0)),      # initial state
        pl.BlockSpec(w_in0.shape, lambda i: (0, 0)),
        pl.BlockSpec(w_deep.shape, lambda i: (0, 0, 0)),
        pl.BlockSpec(biases.shape, lambda i: (0, 0, 0)),
        pl.BlockSpec(w_out.shape, lambda i: (0, 0)),
        pl.BlockSpec(b_out.shape, lambda i: (0, 0)),
    ]

    out_flat, new_state = pl.pallas_call(
        _decoder_kernel,
        out_shape=(
            jax.ShapeDtypeStruct((T * B, O), jnp.float32),
            jax.ShapeDtypeStruct((L, B, H), jnp.float32),
        ),
        grid=(1,),                                         # single invocation
        in_specs=in_specs,
        out_specs=(
            pl.BlockSpec((T * B, O), lambda i: (0, 0)),
            pl.BlockSpec((L, B, H), lambda i: (0, 0, 0)),
        ),
        scratch_shapes=[
            pltpu.VMEM((T * B, 3 * H), jnp.float32),       # layer-0 projection
            pltpu.VMEM((T * B, H), jnp.float32),           # top-layer hidden
        ],
        compiler_params=pltpu.CompilerParams(
            dimension_semantics=("arbitrary",)),
    )(emb_tm, state, w_in0, w_deep, biases, w_out, b_out)

    out = jnp.transpose(out_flat.reshape(T, B, O), (1, 0, 2))  # -> [B, T, O]
    return out, new_state


def init_params(key, embed_size, hidden_size, hidden_layers, output_size):
    """Deterministic synthetic parameters (PyTorch-style uniform(-1/sqrt(H), 1/sqrt(H)));
    layouts already transposed to [in, 3H] with PyTorch gate order r, z, n."""
    H = hidden_size
    k = 1.0 / math.sqrt(H)
    params = {"w_ih": [], "w_hh": [], "b_ih": [], "b_hh": []}
    for l in range(hidden_layers):
        in_l = embed_size if l == 0 else hidden_size
        key, k1, k2, k3, k4 = jax.random.split(key, 5)
        params["w_ih"].append(jax.random.uniform(k1, (in_l, 3 * H), jnp.float32, -k, k))
        params["w_hh"].append(jax.random.uniform(k2, (H, 3 * H), jnp.float32, -k, k))
        params["b_ih"].append(jax.random.uniform(k3, (1, 3 * H), jnp.float32, -k, k))
        params["b_hh"].append(jax.random.uniform(k4, (1, 3 * H), jnp.float32, -k, k))
    key, k5, k6 = jax.random.split(key, 3)
    params["w_out"] = jax.random.uniform(k5, (H, output_size), jnp.float32, -k, k)
    params["b_out"] = jax.random.uniform(k6, (1, output_size), jnp.float32, -k, k)
    return params


def ref_decoder(embeddings, state, params):
    """Pure-JAX reference reproducing the PyTorch Decoder/MyGRU forward."""
    B, T, E = embeddings.shape
    L, _, H = state.shape
    h = state
    origin = 0.2 * state
    outs = []
    for t in range(T):
        h_mod = h if t == 0 else origin + 0.8 * h
        x = embeddings[:, t, :]
        new_h = []
        for l in range(L):
            h_prev = h_mod[l]
            gi = x @ params["w_ih"][l] + params["b_ih"][l]
            gh = h_prev @ params["w_hh"][l] + params["b_hh"][l]
            r = jax.nn.sigmoid(gi[:, :H] + gh[:, :H])
            z = jax.nn.sigmoid(gi[:, H:2 * H] + gh[:, H:2 * H])
            n = jnp.tanh(gi[:, 2 * H:] + r * gh[:, 2 * H:])
            h_new = (1.0 - z) * n + z * h_prev
            new_h.append(h_new)
            x = h_new
        h = jnp.stack(new_h, axis=0)
        outs.append(x @ params["w_out"] + params["b_out"])
    output = jnp.stack(outs, axis=1)
    return output, h


if __name__ == "__main__":
    # Small shapes consistent with Decoder(embed_size, latent_size, hidden_size,
    # hidden_layers, dropout, output_size).
    B, T = 2, 8
    embed_size = 16
    hidden_size = 32
    hidden_layers = 2
    output_size = 48
    # dropout = 0.1  # eval-mode forward => identity.

    key = jax.random.PRNGKey(0)
    kp, ke, ks = jax.random.split(key, 3)

    params = init_params(kp, embed_size, hidden_size, hidden_layers, output_size)
    embeddings = jax.random.normal(ke, (B, T, embed_size), jnp.float32)
    state = jax.random.normal(ks, (hidden_layers, B, hidden_size), jnp.float32)
    lengths = jnp.full((B,), T, dtype=jnp.int32)  # accepted for API parity, unused

    out, new_state = decoder_forward(embeddings, state, lengths, params)
    out = jax.block_until_ready(out)
    new_state = jax.block_until_ready(new_state)

    ref_out, ref_state = ref_decoder(embeddings, state, params)
    assert out.shape == (B, T, output_size)
    assert new_state.shape == (hidden_layers, B, hidden_size)
    assert jnp.allclose(out, ref_out, atol=1e-4, rtol=1e-4)
    assert jnp.allclose(new_state, ref_state, atol=1e-4, rtol=1e-4)

    print("KERNEL_OK")
</pallas_src>

<mosaic_0001>
module attributes {stable_mosaic.version = 11 : i64} {
  func.func @_decoder_kernel(%arg0: i32, %arg1: memref<16x16xf32, #tpu.memory_space<vmem>>, %arg2: memref<2x2x32xf32, #tpu.memory_space<vmem>>, %arg3: memref<16x96xf32, #tpu.memory_space<vmem>>, %arg4: memref<3x32x96xf32, #tpu.memory_space<vmem>>, %arg5: memref<2x4x32xf32, #tpu.memory_space<vmem>>, %arg6: memref<32x48xf32, #tpu.memory_space<vmem>>, %arg7: memref<1x48xf32, #tpu.memory_space<vmem>>, %arg8: memref<16x48xf32, #tpu.memory_space<vmem>>, %arg9: memref<2x2x32xf32, #tpu.memory_space<vmem>>, %arg10: memref<16x96xf32, #tpu.memory_space<vmem>>, %arg11: memref<16x32xf32, #tpu.memory_space<vmem>>) attributes {dimension_semantics = [#tpu.dimension_semantics<arbitrary>], iteration_bounds = array<i64: 1>, scalar_prefetch = 0 : i64, scratch_operands = 2 : i64, tpu.core_type = #tpu.core_type<tc>, window_params = [{pipeline_mode = #tpu.pipeline_mode<synchronous>, transform_indices = @transform_0, window_bounds = array<i64: 16, 16>}, {pipeline_mode = #tpu.pipeline_mode<synchronous>, transform_indices = @transform_1, window_bounds = array<i64: 2, 2, 32>}, {pipeline_mode = #tpu.pipeline_mode<synchronous>, transform_indices = @transform_2, window_bounds = array<i64: 16, 96>}, {pipeline_mode = #tpu.pipeline_mode<synchronous>, transform_indices = @transform_3, window_bounds = array<i64: 3, 32, 96>}, {pipeline_mode = #tpu.pipeline_mode<synchronous>, transform_indices = @transform_4, window_bounds = array<i64: 2, 4, 32>}, {pipeline_mode = #tpu.pipeline_mode<synchronous>, transform_indices = @transform_5, window_bounds = array<i64: 32, 48>}, {pipeline_mode = #tpu.pipeline_mode<synchronous>, transform_indices = @transform_6, window_bounds = array<i64: 1, 48>}, {pipeline_mode = #tpu.pipeline_mode<synchronous>, transform_indices = @transform_7, window_bounds = array<i64: 16, 48>}, {pipeline_mode = #tpu.pipeline_mode<synchronous>, transform_indices = @transform_8, window_bounds = array<i64: 2, 2, 32>}]} {
    %c0 = arith.constant 0 : index
    %c0_0 = arith.constant 0 : index
    %0 = vector.load %arg1[%c0, %c0_0] : memref<16x16xf32, #tpu.memory_space<vmem>>, vector<16x16xf32>
    %c0_1 = arith.constant 0 : index
    %c0_2 = arith.constant 0 : index
    %1 = vector.load %arg3[%c0_1, %c0_2] : memref<16x96xf32, #tpu.memory_space<vmem>>, vector<16x96xf32>
    %cst = arith.constant dense<0.000000e+00> : vector<16x96xf32>
    %2 = tpu.matmul %0, %1, %cst {dimension_numbers = #tpu.dot_dimension_numbers<[1], [0], [0], [1], [0, 0, 1, 1], [], []>} : vector<16x16xf32>, vector<16x96xf32>, vector<16x96xf32> -> vector<16x96xf32>
    %c0_3 = arith.constant 0 : index
    %c0_4 = arith.constant 0 : index
    %3 = vector.load %arg10[%c0_3, %c0_4] : memref<16x96xf32, #tpu.memory_space<vmem>>, vector<16x96xf32>
    tpu.vector_store %arg10[%c0_3, %c0_4], %2 {strides = array<i32>} : memref<16x96xf32, #tpu.memory_space<vmem>>, vector<16x96xf32>,
    %c0_5 = arith.constant 0 : index
    %c0_6 = arith.constant 0 : index
    %c0_7 = arith.constant 0 : index
    %4 = vector.load %arg4[%c0_5, %c0_6, %c0_7] : memref<3x32x96xf32, #tpu.memory_space<vmem>>, vector<1x32x96xf32>
    %5 = vector.shape_cast %4 : vector<1x32x96xf32> to vector<32x96xf32>
    %c1 = arith.constant 1 : index
    %c0_8 = arith.constant 0 : index
    %c0_9 = arith.constant 0 : index
    %6 = vector.load %arg4[%c1, %c0_8, %c0_9] : memref<3x32x96xf32, #tpu.memory_space<vmem>>, vector<1x32x96xf32>
    %7 = vector.shape_cast %6 : vector<1x32x96xf32> to vector<32x96xf32>
    %c2 = arith.constant 2 : index
    %c0_10 = arith.constant 0 : index
    %c0_11 = arith.constant 0 : index
    %8 = vector.load %arg4[%c2, %c0_10, %c0_11] : memref<3x32x96xf32, #tpu.memory_space<vmem>>, vector<1x32x96xf32>
    %9 = vector.shape_cast %8 : vector<1x32x96xf32> to vector<32x96xf32>
    %c0_12 = arith.constant 0 : index
    %c0_13 = arith.constant 0 : index
    %c0_14 = arith.constant 0 : index
    %10 = vector.load %arg5[%c0_12, %c0_13, %c0_14] : memref<2x4x32xf32, #tpu.memory_space<vmem>>, vector<1x4x32xf32>
    %11 = vector.shape_cast %10 : vector<1x4x32xf32> to vector<4x32xf32>
    %12 = vector.extract_strided_slice %11 {offsets = [0, 0], sizes = [1, 32], strides = [1, 1]} : vector<4x32xf32> to vector<1x32xf32>
    %13 = vector.shape_cast %12 : vector<1x32xf32> to vector<1x32xf32>
    %14 = vector.broadcast %13 : vector<1x32xf32> to vector<2x32xf32>
    %15 = vector.extract_strided_slice %11 {offsets = [1, 0], sizes = [1, 32], strides = [1, 1]} : vector<4x32xf32> to vector<1x32xf32>
    %16 = vector.shape_cast %15 : vector<1x32xf32> to vector<1x32xf32>
    %17 = vector.broadcast %16 : vector<1x32xf32> to vector<2x32xf32>
    %18 = vector.extract_strided_slice %11 {offsets = [2, 0], sizes = [1, 32], strides = [1, 1]} : vector<4x32xf32> to vector<1x32xf32>
    %19 = vector.shape_cast %18 : vector<1x32xf32> to vector<1x32xf32>
    %20 = vector.broadcast %19 : vector<1x32xf32> to vector<2x32xf32>
    %21 = vector.extract_strided_slice %11 {offsets = [3, 0], sizes = [1, 32], strides = [1, 1]} : vector<4x32xf32> to vector<1x32xf32>
    %22 = vector.shape_cast %21 : vector<1x32xf32> to vector<1x32xf32>
    %23 = vector.broadcast %22 : vector<1x32xf32> to vector<2x32xf32>
    %c1_15 = arith.constant 1 : index
    %c0_16 = arith.constant 0 : index
    %c0_17 = arith.constant 0 : index
    %24 = vector.load %arg5[%c1_15, %c0_16, %c0_17] : memref<2x4x32xf32, #tpu.memory_space<vmem>>, vector<1x4x32xf32>
    %25 = vector.shape_cast %24 : vector<1x4x32xf32> to vector<4x32xf32>
    %26 = vector.extract_strided_slice %25 {offsets = [0, 0], sizes = [1, 32], strides = [1, 1]} : vector<4x32xf32> to vector<1x32xf32>
    %27 = vector.shape_cast %26 : vector<1x32xf32> to vector<1x32xf32>
    %28 = vector.broadcast %27 : vector<1x32xf32> to vector<2x32xf32>
    %29 = vector.extract_strided_slice %25 {offsets = [1, 0], sizes = [1, 32], strides = [1, 1]} : vector<4x32xf32> to vector<1x32xf32>
    %30 = vector.shape_cast %29 : vector<1x32xf32> to vector<1x32xf32>
    %31 = vector.broadcast %30 : vector<1x32xf32> to vector<2x32xf32>
    %32 = vector.extract_strided_slice %25 {offsets = [2, 0], sizes = [1, 32], strides = [1, 1]} : vector<4x32xf32> to vector<1x32xf32>
    %33 = vector.shape_cast %32 : vector<1x32xf32> to vector<1x32xf32>
    %34 = vector.broadcast %33 : vector<1x32xf32> to vector<2x32xf32>
    %35 = vector.extract_strided_slice %25 {offsets = [3, 0], sizes = [1, 32], strides = [1, 1]} : vector<4x32xf32> to vector<1x32xf32>
    %36 = vector.shape_cast %35 : vector<1x32xf32> to vector<1x32xf32>
    %37 = vector.broadcast %36 : vector<1x32xf32> to vector<2x32xf32>
    %c0_18 = arith.constant 0 : index
    %c0_19 = arith.constant 0 : index
    %c0_20 = arith.constant 0 : index
    %38 = vector.load %arg2[%c0_18, %c0_19, %c0_20] : memref<2x2x32xf32, #tpu.memory_space<vmem>>, vector<1x2x32xf32>
    %39 = vector.shape_cast %38 : vector<1x2x32xf32> to vector<2x32xf32>
    %c1_21 = arith.constant 1 : index
    %c0_22 = arith.constant 0 : index
    %c0_23 = arith.constant 0 : index
    %40 = vector.load %arg2[%c1_21, %c0_22, %c0_23] : memref<2x2x32xf32, #tpu.memory_space<vmem>>, vector<1x2x32xf32>
    %41 = vector.shape_cast %40 : vector<1x2x32xf32> to vector<2x32xf32>
    %cst_24 = arith.constant 2.000000e-01 : f32
    %42 = vector.broadcast %cst_24 : f32 to vector<2x32xf32>
    %43 = arith.mulf %42, %39 : vector<2x32xf32>
    %cst_25 = arith.constant 2.000000e-01 : f32
    %44 = vector.broadcast %cst_25 : f32 to vector<2x32xf32>
    %45 = arith.mulf %44, %41 : vector<2x32xf32>
    %c0_26 = arith.constant 0 : index
    %c0_27 = arith.constant 0 : index
    %46 = vector.load %arg10[%c0_26, %c0_27] : memref<16x96xf32, #tpu.memory_space<vmem>>, vector<2x96xf32>
    %cst_28 = arith.constant dense<0.000000e+00> : vector<2x96xf32>
    %47 = tpu.matmul %39, %5, %cst_28 {dimension_numbers = #tpu.dot_dimension_numbers<[1], [0], [0], [1], [0, 0, 1, 1], [], []>} : vector<2x32xf32>, vector<32x96xf32>, vector<2x96xf32> -> vector<2x96xf32>
    %48 = vector.extract_strided_slice %46 {offsets = [0, 0], sizes = [2, 32], strides = [1, 1]} : vector<2x96xf32> to vector<2x32xf32>
    %49 = vector.extract_strided_slice %47 {offsets = [0, 0], sizes = [2, 32], strides = [1, 1]} : vector<2x96xf32> to vector<2x32xf32>
    %50 = arith.addf %48, %49 : vector<2x32xf32>
    %51 = arith.addf %50, %14 : vector<2x32xf32>
    %52 = arith.negf %51 : vector<2x32xf32>
    %53 = math.exp %52 : vector<2x32xf32>
    %cst_29 = arith.constant 1.000000e+00 : f32
    %54 = vector.broadcast %cst_29 : f32 to vector<2x32xf32>
    %55 = arith.addf %54, %53 : vector<2x32xf32>
    %56 = arith.divf %54, %55 : vector<2x32xf32>
    %57 = vector.extract_strided_slice %46 {offsets = [0, 32], sizes = [2, 32], strides = [1, 1]} : vector<2x96xf32> to vector<2x32xf32>
    %58 = vector.extract_strided_slice %47 {offsets = [0, 32], sizes = [2, 32], strides = [1, 1]} : vector<2x96xf32> to vector<2x32xf32>
    %59 = arith.addf %57, %58 : vector<2x32xf32>
    %60 = arith.addf %59, %17 : vector<2x32xf32>
    %61 = arith.negf %60 : vector<2x32xf32>
    %62 = math.exp %61 : vector<2x32xf32>
    %cst_30 = arith.constant 1.000000e+00 : f32
    %63 = vector.broadcast %cst_30 : f32 to vector<2x32xf32>
    %64 = arith.addf %63, %62 : vector<2x32xf32>
    %65 = arith.divf %63, %64 : vector<2x32xf32>
    %66 = vector.extract_strided_slice %46 {offsets = [0, 64], sizes = [2, 32], strides = [1, 1]} : vector<2x96xf32> to vector<2x32xf32>
    %67 = arith.addf %66, %20 : vector<2x32xf32>
    %68 = vector.extract_strided_slice %47 {offsets = [0, 64], sizes = [2, 32], strides = [1, 1]} : vector<2x96xf32> to vector<2x32xf32>
    %69 = arith.addf %68, %23 : vector<2x32xf32>
    %70 = arith.mulf %56, %69 : vector<2x32xf32>
    %71 = arith.addf %67, %70 : vector<2x32xf32>
    %72 = math.tanh %71 : vector<2x32xf32>
    %cst_31 = arith.constant 1.000000e+00 : f32
    %73 = vector.broadcast %cst_31 : f32 to vector<2x32xf32>
    %74 = arith.subf %73, %65 : vector<2x32xf32>
    %75 = arith.mulf %74, %72 : vector<2x32xf32>
    %76 = arith.mulf %65, %39 : vector<2x32xf32>
    %77 = arith.addf %75, %76 : vector<2x32xf32>
    %cst_32 = arith.constant dense<0.000000e+00> : vector<2x96xf32>
    %78 = tpu.matmul %77, %9, %cst_32 {dimension_numbers = #tpu.dot_dimension_numbers<[1], [0], [0], [1], [0, 0, 1, 1], [], []>} : vector<2x32xf32>, vector<32x96xf32>, vector<2x96xf32> -> vector<2x96xf32>
    %cst_33 = arith.constant dense<0.000000e+00> : vector<2x96xf32>
    %79 = tpu.matmul %41, %7, %cst_33 {dimension_numbers = #tpu.dot_dimension_numbers<[1], [0], [0], [1], [0, 0, 1, 1], [], []>} : vector<2x32xf32>, vector<32x96xf32>, vector<2x96xf32> -> vector<2x96xf32>
    %80 = vector.extract_strided_slice %78 {offsets = [0, 0], sizes = [2, 32], strides = [1, 1]} : vector<2x96xf32> to vector<2x32xf32>
    %81 = vector.extract_strided_slice %79 {offsets = [0, 0], sizes = [2, 32], strides = [1, 1]} : vector<2x96xf32> to vector<2x32xf32>
    %82 = arith.addf %80, %81 : vector<2x32xf32>
    %83 = arith.addf %82, %28 : vector<2x32xf32>
    %84 = arith.negf %83 : vector<2x32xf32>
    %85 = math.exp %84 : vector<2x32xf32>
    %cst_34 = arith.constant 1.000000e+00 : f32
    %86 = vector.broadcast %cst_34 : f32 to vector<2x32xf32>
    %87 = arith.addf %86, %85 : vector<2x32xf32>
    %88 = arith.divf %86, %87 : vector<2x32xf32>
    %89 = vector.extract_strided_slice %78 {offsets = [0, 32], sizes = [2, 32], strides = [1, 1]} : vector<2x96xf32> to vector<2x32xf32>
    %90 = vector.extract_strided_slice %79 {offsets = [0, 32], sizes = [2, 32], strides = [1, 1]} : vector<2x96xf32> to vector<2x32xf32>
    %91 = arith.addf %89, %90 : vector<2x32xf32>
    %92 = arith.addf %91, %31 : vector<2x32xf32>
    %93 = arith.negf %92 : vector<2x32xf32>
    %94 = math.exp %93 : vector<2x32xf32>
    %cst_35 = arith.constant 1.000000e+00 : f32
    %95 = vector.broadcast %cst_35 : f32 to vector<2x32xf32>
    %96 = arith.addf %95, %94 : vector<2x32xf32>
    %97 = arith.divf %95, %96 : vector<2x32xf32>
    %98 = vector.extract_strided_slice %78 {offsets = [0, 64], sizes = [2, 32], strides = [1, 1]} : vector<2x96xf32> to vector<2x32xf32>
    %99 = arith.addf %98, %34 : vector<2x32xf32>
    %100 = vector.extract_strided_slice %79 {offsets = [0, 64], sizes = [2, 32], strides = [1, 1]} : vector<2x96xf32> to vector<2x32xf32>
    %101 = arith.addf %100, %37 : vector<2x32xf32>
    %102 = arith.mulf %88, %101 : vector<2x32xf32>
    %103 = arith.addf %99, %102 : vector<2x32xf32>
    %104 = math.tanh %103 : vector<2x32xf32>
    %cst_36 = arith.constant 1.000000e+00 : f32
    %105 = vector.broadcast %cst_36 : f32 to vector<2x32xf32>
    %106 = arith.subf %105, %97 : vector<2x32xf32>
    %107 = arith.mulf %106, %104 : vector<2x32xf32>
    %108 = arith.mulf %97, %41 : vector<2x32xf32>
    %109 = arith.addf %107, %108 : vector<2x32xf32>
    %c0_37 = arith.constant 0 : index
    %c0_38 = arith.constant 0 : index
    %110 = vector.load %arg11[%c0_37, %c0_38] : memref<16x32xf32, #tpu.memory_space<vmem>>, vector<2x32xf32>
    tpu.vector_store %arg11[%c0_37, %c0_38], %109 {strides = array<i32>} : memref<16x32xf32, #tpu.memory_space<vmem>>, vector<2x32xf32>,
    %c1_i32 = arith.constant 1 : i32
    %c7_i32 = arith.constant 7 : i32
    %111 = arith.addi %c1_i32, %c7_i32 : i32
    %c1_i32_39 = arith.constant 1 : i32
    %112:2 = scf.for %arg12 = %c1_i32 to %111 step %c1_i32_39 iter_args(%arg13 = %77, %arg14 = %109) -> (vector<2x32xf32>, vector<2x32xf32>)  : i32 {
      %cst_56 = arith.constant 8.000000e-01 : f32
      %126 = vector.broadcast %cst_56 : f32 to vector<2x32xf32>
      %127 = arith.mulf %126, %arg13 : vector<2x32xf32>
      %128 = arith.addf %43, %127 : vector<2x32xf32>
      %cst_57 = arith.constant 8.000000e-01 : f32
      %129 = vector.broadcast %cst_57 : f32 to vector<2x32xf32>
      %130 = arith.mulf %129, %arg14 : vector<2x32xf32>
      %131 = arith.addf %45, %130 : vector<2x32xf32>
      %c2_i32 = arith.constant 2 : i32
      %132 = arith.muli %arg12, %c2_i32 : i32
      %133 = arith.index_cast %132 : i32 to index
      %c0_58 = arith.constant 0 : index
      %134 = vector.load %arg10[%133, %c0_58] : memref<16x96xf32, #tpu.memory_space<vmem>>, vector<2x96xf32>
      %cst_59 = arith.constant dense<0.000000e+00> : vector<2x96xf32>
      %135 = tpu.matmul %128, %5, %cst_59 {dimension_numbers = #tpu.dot_dimension_numbers<[1], [0], [0], [1], [0, 0, 1, 1], [], []>} : vector<2x32xf32>, vector<32x96xf32>, vector<2x96xf32> -> vector<2x96xf32>
      %136 = vector.extract_strided_slice %134 {offsets = [0, 0], sizes = [2, 32], strides = [1, 1]} : vector<2x96xf32> to vector<2x32xf32>
      %137 = vector.extract_strided_slice %135 {offsets = [0, 0], sizes = [2, 32], strides = [1, 1]} : vector<2x96xf32> to vector<2x32xf32>
      %138 = arith.addf %136, %137 : vector<2x32xf32>
      %139 = arith.addf %138, %14 : vector<2x32xf32>
      %140 = arith.negf %139 : vector<2x32xf32>
      %141 = math.exp %140 : vector<2x32xf32>
      %cst_60 = arith.constant 1.000000e+00 : f32
      %142 = vector.broadcast %cst_60 : f32 to vector<2x32xf32>
      %143 = arith.addf %142, %141 : vector<2x32xf32>
      %144 = arith.divf %142, %143 : vector<2x32xf32>
      %145 = vector.extract_strided_slice %134 {offsets = [0, 32], sizes = [2, 32], strides = [1, 1]} : vector<2x96xf32> to vector<2x32xf32>
      %146 = vector.extract_strided_slice %135 {offsets = [0, 32], sizes = [2, 32], strides = [1, 1]} : vector<2x96xf32> to vector<2x32xf32>
      %147 = arith.addf %145, %146 : vector<2x32xf32>
      %148 = arith.addf %147, %17 : vector<2x32xf32>
      %149 = arith.negf %148 : vector<2x32xf32>
      %150 = math.exp %149 : vector<2x32xf32>
      %cst_61 = arith.constant 1.000000e+00 : f32
      %151 = vector.broadcast %cst_61 : f32 to vector<2x32xf32>
      %152 = arith.addf %151, %150 : vector<2x32xf32>
      %153 = arith.divf %151, %152 : vector<2x32xf32>
      %154 = vector.extract_strided_slice %134 {offsets = [0, 64], sizes = [2, 32], strides = [1, 1]} : vector<2x96xf32> to vector<2x32xf32>
      %155 = arith.addf %154, %20 : vector<2x32xf32>
      %156 = vector.extract_strided_slice %135 {offsets = [0, 64], sizes = [2, 32], strides = [1, 1]} : vector<2x96xf32> to vector<2x32xf32>
      %157 = arith.addf %156, %23 : vector<2x32xf32>
      %158 = arith.mulf %144, %157 : vector<2x32xf32>
      %159 = arith.addf %155, %158 : vector<2x32xf32>
      %160 = math.tanh %159 : vector<2x32xf32>
      %cst_62 = arith.constant 1.000000e+00 : f32
      %161 = vector.broadcast %cst_62 : f32 to vector<2x32xf32>
      %162 = arith.subf %161, %153 : vector<2x32xf32>
      %163 = arith.mulf %162, %160 : vector<2x32xf32>
      %164 = arith.mulf %153, %128 : vector<2x32xf32>
      %165 = arith.addf %163, %164 : vector<2x32xf32>
      %cst_63 = arith.constant dense<0.000000e+00> : vector<2x96xf32>
      %166 = tpu.matmul %165, %9, %cst_63 {dimension_numbers = #tpu.dot_dimension_numbers<[1], [0], [0], [1], [0, 0, 1, 1], [], []>} : vector<2x32xf32>, vector<32x96xf32>, vector<2x96xf32> -> vector<2x96xf32>
      %cst_64 = arith.constant dense<0.000000e+00> : vector<2x96xf32>
      %167 = tpu.matmul %131, %7, %cst_64 {dimension_numbers = #tpu.dot_dimension_numbers<[1], [0], [0], [1], [0, 0, 1, 1], [], []>} : vector<2x32xf32>, vector<32x96xf32>, vector<2x96xf32> -> vector<2x96xf32>
      %168 = vector.extract_strided_slice %166 {offsets = [0, 0], sizes = [2, 32], strides = [1, 1]} : vector<2x96xf32> to vector<2x32xf32>
      %169 = vector.extract_strided_slice %167 {offsets = [0, 0], sizes = [2, 32], strides = [1, 1]} : vector<2x96xf32> to vector<2x32xf32>
      %170 = arith.addf %168, %169 : vector<2x32xf32>
      %171 = arith.addf %170, %28 : vector<2x32xf32>
      %172 = arith.negf %171 : vector<2x32xf32>
      %173 = math.exp %172 : vector<2x32xf32>
      %cst_65 = arith.constant 1.000000e+00 : f32
      %174 = vector.broadcast %cst_65 : f32 to vector<2x32xf32>
      %175 = arith.addf %174, %173 : vector<2x32xf32>
      %176 = arith.divf %174, %175 : vector<2x32xf32>
      %177 = vector.extract_strided_slice %166 {offsets = [0, 32], sizes = [2, 32], strides = [1, 1]} : vector<2x96xf32> to vector<2x32xf32>
      %178 = vector.extract_strided_slice %167 {offsets = [0, 32], sizes = [2, 32], strides = [1, 1]} : vector<2x96xf32> to vector<2x32xf32>
      %179 = arith.addf %177, %178 : vector<2x32xf32>
      %180 = arith.addf %179, %31 : vector<2x32xf32>
      %181 = arith.negf %180 : vector<2x32xf32>
      %182 = math.exp %181 : vector<2x32xf32>
      %cst_66 = arith.constant 1.000000e+00 : f32
      %183 = vector.broadcast %cst_66 : f32 to vector<2x32xf32>
      %184 = arith.addf %183, %182 : vector<2x32xf32>
      %185 = arith.divf %183, %184 : vector<2x32xf32>
      %186 = vector.extract_strided_slice %166 {offsets = [0, 64], sizes = [2, 32], strides = [1, 1]} : vector<2x96xf32> to vector<2x32xf32>
      %187 = arith.addf %186, %34 : vector<2x32xf32>
      %188 = vector.extract_strided_slice %167 {offsets = [0, 64], sizes = [2, 32], strides = [1, 1]} : vector<2x96xf32> to vector<2x32xf32>
      %189 = arith.addf %188, %37 : vector<2x32xf32>
      %190 = arith.mulf %176, %189 : vector<2x32xf32>
      %191 = arith.addf %187, %190 : vector<2x32xf32>
      %192 = math.tanh %191 : vector<2x32xf32>
      %cst_67 = arith.constant 1.000000e+00 : f32
      %193 = vector.broadcast %cst_67 : f32 to vector<2x32xf32>
      %194 = arith.subf %193, %185 : vector<2x32xf32>
      %195 = arith.mulf %194, %192 : vector<2x32xf32>
      %196 = arith.mulf %185, %131 : vector<2x32xf32>
      %197 = arith.addf %195, %196 : vector<2x32xf32>
      %c2_i32_68 = arith.constant 2 : i32
      %198 = arith.muli %arg12, %c2_i32_68 : i32
      %199 = arith.index_cast %198 : i32 to index
      %c0_69 = arith.constant 0 : index
      %200 = vector.load %arg11[%199, %c0_69] : memref<16x32xf32, #tpu.memory_space<vmem>>, vector<2x32xf32>
      tpu.vector_store %arg11[%199, %c0_69], %197 {strides = array<i32>} : memref<16x32xf32, #tpu.memory_space<vmem>>, vector<2x32xf32>,
      scf.yield %165, %197 : vector<2x32xf32>, vector<2x32xf32>
    }
    %c7_i32_40 = arith.constant 7 : i32
    %c0_41 = arith.constant 0 : index
    %c0_42 = arith.constant 0 : index
    %c0_43 = arith.constant 0 : index
    %113 = vector.load %arg9[%c0_41, %c0_42, %c0_43] : memref<2x2x32xf32, #tpu.memory_space<vmem>>, vector<1x2x32xf32>
    %114 = vector.shape_cast %113 : vector<1x2x32xf32> to vector<2x32xf32>
    %115 = vector.shape_cast %112#0 : vector<2x32xf32> to vector<1x2x32xf32>
    tpu.vector_store %arg9[%c0_41, %c0_42, %c0_43], %115 {strides = array<i32>} : memref<2x2x32xf32, #tpu.memory_space<vmem>>, vector<1x2x32xf32>,
    %c1_44 = arith.constant 1 : index
    %c0_45 = arith.constant 0 : index
    %c0_46 = arith.constant 0 : index
    %116 = vector.load %arg9[%c1_44, %c0_45, %c0_46] : memref<2x2x32xf32, #tpu.memory_space<vmem>>, vector<1x2x32xf32>
    %117 = vector.shape_cast %116 : vector<1x2x32xf32> to vector<2x32xf32>
    %118 = vector.shape_cast %112#1 : vector<2x32xf32> to vector<1x2x32xf32>
    tpu.vector_store %arg9[%c1_44, %c0_45, %c0_46], %118 {strides = array<i32>} : memref<2x2x32xf32, #tpu.memory_space<vmem>>, vector<1x2x32xf32>,
    %c0_47 = arith.constant 0 : index
    %c0_48 = arith.constant 0 : index
    %119 = vector.load %arg11[%c0_47, %c0_48] : memref<16x32xf32, #tpu.memory_space<vmem>>, vector<16x32xf32>
    %c0_49 = arith.constant 0 : index
    %c0_50 = arith.constant 0 : index
    %120 = vector.load %arg6[%c0_49, %c0_50] : memref<32x48xf32, #tpu.memory_space<vmem>>, vector<32x48xf32>
    %cst_51 = arith.constant dense<0.000000e+00> : vector<16x48xf32>
    %121 = tpu.matmul %119, %120, %cst_51 {dimension_numbers = #tpu.dot_dimension_numbers<[1], [0], [0], [1], [0, 0, 1, 1], [], []>} : vector<16x32xf32>, vector<32x48xf32>, vector<16x48xf32> -> vector<16x48xf32>
    %c0_52 = arith.constant 0 : index
    %c0_53 = arith.constant 0 : index
    %122 = vector.load %arg7[%c0_52, %c0_53] : memref<1x48xf32, #tpu.memory_space<vmem>>, vector<1x48xf32>
    %123 = vector.broadcast %122 : vector<1x48xf32> to vector<16x48xf32>
    %124 = arith.addf %121, %123 : vector<16x48xf32>
    %c0_54 = arith.constant 0 : index
    %c0_55 = arith.constant 0 : index
    %125 = vector.load %arg8[%c0_54, %c0_55] : memref<16x48xf32, #tpu.memory_space<vmem>>, vector<16x48xf32>
    tpu.vector_store %arg8[%c0_54, %c0_55], %124 {strides = array<i32>} : memref<16x48xf32, #tpu.memory_space<vmem>>, vector<16x48xf32>,
    return
  }
  func.func @transform_0(%arg0: i32) -> (i32, i32) {
    %c0_i32 = arith.constant 0 : i32
    %c0_i32_0 = arith.constant 0 : i32
    %c0_i32_1 = arith.constant 0 : i32
    return %c0_i32, %c0_i32_0 : i32, i32
  }
  func.func @transform_1(%arg0: i32) -> (i32, i32, i32) {
    %c0_i32 = arith.constant 0 : i32
    %c0_i32_0 = arith.constant 0 : i32
    %c0_i32_1 = arith.constant 0 : i32
    %c0_i32_2 = arith.constant 0 : i32
    return %c0_i32, %c0_i32_0, %c0_i32_1 : i32, i32, i32
  }
  func.func @transform_2(%arg0: i32) -> (i32, i32) {
    %c0_i32 = arith.constant 0 : i32
    %c0_i32_0 = arith.constant 0 : i32
    %c0_i32_1 = arith.constant 0 : i32
    return %c0_i32, %c0_i32_0 : i32, i32
  }
  func.func @transform_3(%arg0: i32) -> (i32, i32, i32) {
    %c0_i32 = arith.constant 0 : i32
    %c0_i32_0 = arith.constant 0 : i32
    %c0_i32_1 = arith.constant 0 : i32
    %c0_i32_2 = arith.constant 0 : i32
    return %c0_i32, %c0_i32_0, %c0_i32_1 : i32, i32, i32
  }
  func.func @transform_4(%arg0: i32) -> (i32, i32, i32) {
    %c0_i32 = arith.constant 0 : i32
    %c0_i32_0 = arith.constant 0 : i32
    %c0_i32_1 = arith.constant 0 : i32
    %c0_i32_2 = arith.constant 0 : i32
    return %c0_i32, %c0_i32_0, %c0_i32_1 : i32, i32, i32
  }
  func.func @transform_5(%arg0: i32) -> (i32, i32) {
    %c0_i32 = arith.constant 0 : i32
    %c0_i32_0 = arith.constant 0 : i32
    %c0_i32_1 = arith.constant 0 : i32
    return %c0_i32, %c0_i32_0 : i32, i32
  }
  func.func @transform_6(%arg0: i32) -> (i32, i32) {
    %c0_i32 = arith.constant 0 : i32
    %c0_i32_0 = arith.constant 0 : i32
    %c0_i32_1 = arith.constant 0 : i32
    return %c0_i32, %c0_i32_0 : i32, i32
  }
  func.func @transform_7(%arg0: i32) -> (i32, i32) {
    %c0_i32 = arith.constant 0 : i32
    %c0_i32_0 = arith.constant 0 : i32
    %c0_i32_1 = arith.constant 0 : i32
    return %c0_i32, %c0_i32_0 : i32, i32
  }
  func.func @transform_8(%arg0: i32) -> (i32, i32, i32) {
    %c0_i32 = arith.constant 0 : i32
    %c0_i32_0 = arith.constant 0 : i32
    %c0_i32_1 = arith.constant 0 : i32
    %c0_i32_2 = arith.constant 0 : i32
    return %c0_i32, %c0_i32_0, %c0_i32_1 : i32, i32, i32
  }
}

</mosaic_0001>

<bundles_post_ra>
// kernel: tpu_custom_call.1
= control target key start
LH: loop header
LB: loop body
LE: loop exit
PB: predicated region body
PF: predicated region fallthrough
CT: control target
= control target key end

     0   :  { %14 = vsyncpa [#allocation5], 0  ;;  %s1869_s0 = inlined_call_operand.hbm [shape: f32[16,16], index: 0, kind: input, shape index: {}]   ;;  %s1870_s1 = inlined_call_operand.hbm [shape: f32[2,2,32], index: 1, kind: input, shape index: {}]   ;;  %s1871_s2 = inlined_call_operand.hbm [shape: f32[16,96], index: 2, kind: input, shape index: {}]   ;;  %s1872_s3 = inlined_call_operand.hbm [shape: f32[3,32,96], index: 3, kind: input, shape index: {}]   ;;  %s1873_s4 = inlined_call_operand.vmem [shape: f32[2,4,32], index: 4, kind: input, shape index: {}]   ;;  %s1874_s5 = inlined_call_operand.hbm [shape: f32[32,48], index: 5, kind: input, shape index: {}]   ;;  %s1875_s6 = inlined_call_operand.vmem [shape: f32[1,48], index: 6, kind: input, shape index: {}]   ;;  %s1876_s7 = inlined_call_operand.hbm [shape: f32[16,48], index: 7, kind: output, shape index: {0}]   ;;  %s1877_s8 = inlined_call_operand.hbm [shape: f32[2,2,32], index: 8, kind: output, shape index: {1}]  }
   0x1   :  { %15 = vsyncpa [#allocation8], 0 }
   0x2   :  { %16 = vsyncpa [#allocation11], 0 }
   0x3   :  { %17 = vsyncpa [#allocation6], 0 }
   0x4   :  { %18 = vsyncpa [#allocation15], 0  ;;  %s1525_s27 = smov [#allocation7]   ;;  %s1337_s9 = scalar_lea.hbm %s1870_s1, 64 }
   0x5   :  { %s36_s28 = sshll.u32 %s1525_s27, 4  ;;  %p1338_p0 = scmp.ne.s32.totalorder %s1870_s1, %s1337_s9  ;;  %s37_s28 = int_to_ptr.vmem [resolvable:$true] %s36_s28 }
   0x6   :  { %p1341_p1 = scmp.lt.u32.totalorder %s1337_s9, %s1870_s1 }
   0x8   :  { %p1343_p2 = pnand %p1341_p1, %p1338_p0 }
   0xa   :  { %1346 = shalt.err (!%p1343_p2)
}
   0xb   :  { %s1347_s14 = scalar_lea.vmem %s37_s28, 64  ;;  %p1352_p4 = scmp.lt.s32.totalorder %s37_s28, %s37_s28 }
   0xc   :  { %p1348_p3 = scmp.ne.s32.totalorder %s37_s28, %s1347_s14  ;;  %p1353_p5 = scmp.lt.s32.totalorder %s1347_s14, %s1347_s14 }
   0xe   :  { %p1354_p6 = por %p1353_p5, %p1352_p4 }
  0x10   :  { %p1355_p7 = pnand %p1354_p6, %p1348_p3 }
  0x12   :  { %1358 = shalt.err (!%p1355_p7)
}
  0x13   :  { %s1526_s15 = smov 32   ;;  %s1527_s16 = smov 2  }
  0x14   :  { %42 = dma.hbm_to_vmem [thread:$0]  %s1870_s1, 64, %s37_s28, [#allocation8], %s1526_s15, %s1526_s15, %s1527_s16  }
  0x15   :  { %s1528_s19 = smov [#allocation10]   ;;  %s1529_s21 = smov [#allocation4]  }
  0x16   :  { %s60_s20 = sshll.u32 %s1528_s19, 4  ;;  %s24_s22 = sshll.u32 %s1529_s21, 4  ;;  %s61_s20 = int_to_ptr.vmem [resolvable:$true] %s60_s20  ;;  %s25_s22 = int_to_ptr.vmem [resolvable:$true] %s24_s22 }
  0x17   :  { %s1359_s25 = scalar_lea.hbm %s1872_s3, 1536 }
  0x18   :  { %p1360_p8 = scmp.ne.s32.totalorder %s1872_s3, %s1359_s25  ;;  %p1363_p9 = scmp.lt.u32.totalorder %s1359_s25, %s1872_s3 }
  0x1a   :  { %p1365_p10 = pnand %p1363_p9, %p1360_p8 }
  0x1c   :  { %1368 = shalt.err (!%p1365_p10)
}
  0x1d   :  { %s1369_s1 = scalar_lea.vmem %s61_s20, 1536  ;;  %p1374_p12 = scmp.lt.s32.totalorder %s61_s20, %s61_s20 }
  0x1e   :  { %p1370_p11 = scmp.ne.s32.totalorder %s61_s20, %s1369_s1  ;;  %p1375_p13 = scmp.lt.s32.totalorder %s1369_s1, %s1369_s1 }
  0x20   :  { %p1376_p0 = por %p1375_p13, %p1374_p12 }
  0x22   :  { %p1377_p1 = pnand %p1376_p0, %p1370_p11 }
  0x24   :  { %1380 = shalt.err (!%p1377_p1)
}
  0x25   :  { %s1530_s28 = smov 128   ;;  %s1531_s9 = smov 8  }
  0x26   :  { %66 = dma.hbm_to_vmem [thread:$0]  %s1872_s3, 1536, %s61_s20, [#allocation11], %s1530_s28, %s1530_s28, %s1531_s9  }
  0x27   :  { %s1381_s14 = scalar_lea.hbm %s1869_s0, 256 }
  0x28   :  { %p1382_p2 = scmp.ne.s32.totalorder %s1869_s0, %s1381_s14  ;;  %p1385_p3 = scmp.lt.u32.totalorder %s1381_s14, %s1869_s0 }
  0x2a   :  { %p1387_p4 = pnand %p1385_p3, %p1382_p2 }
  0x2c   :  { %1390 = shalt.err (!%p1387_p4)
}
  0x2d   :  { %s1391_s23 = scalar_lea.vmem %s25_s22, 256  ;;  %p1396_p6 = scmp.lt.s32.totalorder %s25_s22, %s25_s22 }
  0x2e   :  { %p1392_p5 = scmp.ne.s32.totalorder %s25_s22, %s1391_s23  ;;  %p1397_p7 = scmp.lt.s32.totalorder %s1391_s23, %s1391_s23 }
  0x30   :  { %p1398_p8 = por %p1397_p7, %p1396_p6 }
  0x32   :  { %p1399_p9 = pnand %p1398_p8, %p1392_p5 }
  0x34   :  { %1402 = shalt.err (!%p1399_p9)
}
  0x35   :  { %30 = dma.hbm_to_vmem [thread:$0]  %s1869_s0, 256, %s25_s22, [#allocation5], %s1530_s28, %s1530_s28, %s1531_s9  }
  0x36   :  { %s1532_s24 = smov [#allocation9]   ;;  %s1533_s26 = smov [#allocation12]  }
  0x37   :  { %s48_s25 = sshll.u32 %s1532_s24, 4  ;;  %s74_s27 = sshll.u32 %s1533_s26, 4  ;;  %s49_s25 = int_to_ptr.vmem [resolvable:$true] %s48_s25  ;;  %s75_s27 = int_to_ptr.vmem [resolvable:$true] %s74_s27 }
  0x38   :  { %s1403_s1 = scalar_lea.hbm %s1871_s2, 256 }
  0x39   :  { %p1404_p10 = scmp.ne.s32.totalorder %s1871_s2, %s1403_s1  ;;  %p1407_p11 = scmp.lt.u32.totalorder %s1403_s1, %s1871_s2 }
  0x3b   :  { %p1409_p12 = pnand %p1407_p11, %p1404_p10 }
  0x3d   :  { %1412 = shalt.err (!%p1409_p12)
}
  0x3e   :  { %s1413_s0 = scalar_lea.vmem %s49_s25, 256  ;;  %p1418_p0 = scmp.lt.s32.totalorder %s49_s25, %s49_s25 }
  0x3f   :  { %p1414_p13 = scmp.ne.s32.totalorder %s49_s25, %s1413_s0  ;;  %p1419_p1 = scmp.lt.s32.totalorder %s1413_s0, %s1413_s0 }
  0x41   :  { %p1420_p2 = por %p1419_p1, %p1418_p0 }
  0x43   :  { %p1421_p3 = pnand %p1420_p2, %p1414_p13 }
  0x45   :  { %1424 = shalt.err (!%p1421_p3)
}
  0x46   :  { %54 = dma.hbm_to_vmem [thread:$0]  %s1871_s2, 256, %s49_s25, [#allocation8], %s1530_s28, %s1530_s28, %s1531_s9  }
  0x47   :  { %s1425_s19 = scalar_lea.hbm %s1874_s5, 512 }
  0x48   :  { %p1426_p4 = scmp.ne.s32.totalorder %s1874_s5, %s1425_s19  ;;  %p1429_p5 = scmp.lt.u32.totalorder %s1425_s19, %s1874_s5 }
  0x4a   :  { %p1431_p6 = pnand %p1429_p5, %p1426_p4 }
  0x4c   :  { %1434 = shalt.err (!%p1431_p6)
}
  0x4d   :  { %s1435_s24 = scalar_lea.vmem %s75_s27, 512  ;;  %p1440_p8 = scmp.lt.s32.totalorder %s75_s27, %s75_s27 }
  0x4e   :  { %p1436_p7 = scmp.ne.s32.totalorder %s75_s27, %s1435_s24  ;;  %p1441_p9 = scmp.lt.s32.totalorder %s1435_s24, %s1435_s24 }
  0x50   :  { %p1442_p10 = por %p1441_p9, %p1440_p8 }
  0x52   :  { %p1443_p11 = pnand %p1442_p10, %p1436_p7 }
  0x54   :  { %1446 = shalt.err (!%p1443_p11)
}
  0x55   :  { %80 = dma.hbm_to_vmem [thread:$0]  %s1874_s5, 512, %s75_s27, [#allocation11], %s1530_s28, %s1530_s28, %s1531_s9  }
  0x56   :  { %1503 = dma.done.wait [#allocation5], 256  }
  0x57   :  { %1504 = vsyncadd [#allocation5], 4294967040 }
  0x58   :  { %1505 = dma.done.wait [#allocation8], 320  }
  0x59   :  { %1506 = vsyncadd [#allocation8], 4294966976 }
  0x5a   :  { %1507 = dma.done.wait [#allocation11], 2048  }
  0x5b   :  { %1508 = vsyncadd [#allocation11], 4294965248  ;;  %v1534_v0 = vmov 0.0|0.0   ;;  %vm1535_vm0 = vmmov 0   ;;  %v1536_v1 = vmov 0.0   ;;  %v202_v2 = vlaneseq  ;;  %v100_v4 = vld [vmem:[#allocation9] sm:$0xff] }
  0x5c   :  { %1207 = vmatprep.subr.bf16.mxu1 %v1534_v0  ;;  %1134 = vmatprep.mubr.msk.f32.mxu1 %vm1535_vm0, %v1536_v1  ;;  %vm102_vm1 = vcmask 130048   ;;  %v101_v5 = vld [vmem:[#allocation9 + $0x8] sm:$0xff]  ;;  %v187_v6 = vld [vmem:[#allocation10] sm:$0xff]  ;;  %v188_v10 = vld [vmem:[#allocation10 + $0x8] sm:$0xff]  ;;  %s1537_s27 = smov 64   ;;  %vm242_vm2 = vcmask 261120  }
  0x5d   :  { %v1669_v3 = vshrl.u32 %v202_v2, 7  ;;  %v1203_v9 = vpack.c.bf16 %v101_v5, %v100_v4  ;;  %v98_v11 = vld [vmem:[#allocation4] sm:$0xff]  ;;  %v1673_v12 = vpack.c.bf16 %v188_v10, %v187_v6  ;;  %v189_v13 = vld [vmem:[#allocation10 + $0x10] sm:$0xff]  ;;  %v236_v15 = vld [vmem:[#allocation7] sm:$0x3]  ;;  %vm184_vm3 = vcmask 785408  }
  0x5e   :  { %1123 = vmatprep.mubr.msk.f32.mxu0 %vm102_vm1, %v98_v11  ;;  %v190_v14 = vld [vmem:[#allocation10 + $0x18] sm:$0xff]  ;;  %v1676_v16 = vmul.f32 0.2, %v236_v15  ;;  %v99_v18 = vld [vmem:[#allocation4 + $0x8] sm:$0xff]  ;;  %v194_v47 = vld [vmem:[#allocation10 + $0x30] sm:$0xff]  ;;  %s1538_s29 = smov 96  }
  0x5f   :  { %v216_v7 = vsub.s32 3, %v1669_v3  ;;  %v212_v8 = vsub.s32 2, %v1669_v3  ;;  %1204 = vmatprep.subr.bf16.mxu0 %v1203_v9  ;;  %v201_v17 = vld [vmem:[%s1873_s4] sm:$0xf]  ;;  %1209 = vmatpush3.bf16.msra.mxu1 %v1673_v12  ;;  %v1682_v19 = vpack.c.bf16 %v190_v14, %v189_v13  ;;  %v208_v25 = vsub.s32 1, %v1669_v3  ;;  %v192_v45 = vld [vmem:[#allocation10 + $0x20] sm:$0xff] }
  0x60   :  { %1206 = vmatpush3.bf16.msra.mxu0 %v1203_v9  ;;  %1210 = vmatprep.subr.bf16.mxu1 %v1534_v0  ;;  %v204_v30 = vsub.s32 0, %v1669_v3  ;;  %v193_v46 = vld [vmem:[#allocation10 + $0x28] sm:$0xff]  ;;  %v195_v49 = vld [vmem:[#allocation10 + $0x38] sm:$0xff]  ;;  %v197_v51 = vld [vmem:[#allocation10 + $0x40] sm:$0xff]  ;;  %vm570_vm4 = vcmask 254976  }
  0x61   :  { %v217_v20 = vrot.slane %v201_v17, %v216_v7  ;;  %v213_v21 = vrot.slane %v201_v17, %v212_v8  ;;  %1213 = vmatprep.subr.bf16.mxu0 %v1534_v0  ;;  %v209_v29 = vrot.slane %v201_v17, %v208_v25  ;;  %v1717_v48 = vpack.c.bf16 %v193_v46, %v192_v45  ;;  %v238_v50 = vld [vmem:[#allocation7 + $0x2] sm:$0x3]  ;;  %v199_v54 = vld [vmem:[#allocation10 + $0x50] sm:$0xff]  ;;  %v200_v55 = vld [vmem:[#allocation10 + $0x58] sm:$0xff] }
  0x62   :  { %v1710_v32 = vrot.slane %v201_v17, %v204_v30  ;;  %v1719_v52 = vmul.f32 0.2, %v238_v50  ;;  %v198_v53 = vld [vmem:[#allocation10 + $0x48] sm:$0xff]  ;;  %v1722_v56 = vpack.c.bf16 %v195_v49, %v194_v47  ;;  %v1728_v58 = vpack.c.bf16 %v200_v55, %v199_v54 }
  0x63   :  { %341 = vrot.lane.b32.xlu0 %v217_v20, %s1537_s27  ;;  %336 = vrot.lane.b32.xlu1 %v213_v21, %s1537_s27  ;;  %v1724_v57 = vpack.c.bf16 %v198_v53, %v197_v51 }
  0x64   :  { %1124 = vmatmul.mubr.msk.f32.vlgmr.msra.gmra.mrb[0].mxu0 %vm102_vm1, %v99_v18  ;;  %1212 = vmatpush3.bf16.msra.mxu1 %v1682_v19 }
  0x65   :  { %1145 = vmatprep.mubr.msk.f32.mxu0 %vm1535_vm0, %v1536_v1  ;;  %1219 = vmatprep.subr.bf16.mxu1 %v1534_v0 }
  0x66   :  { %1215 = vmatpush3.bf16.msra.mxu0 %v1724_v57 }
  0x67   :  { %1135 = vmatmul.mubr.msk.f32.vlgmr.msra.gmra.mrb[0].mxu1 %vm242_vm2, %v236_v15  ;;  %1216 = vmatprep.subr.bf16.mxu0 %v1534_v0 }
  0x68   :  { %1156 = vmatprep.mubr.msk.f32.mxu1 %vm1535_vm0, %v1536_v1  ;;  %1221 = vmatpush3.bf16.msra.mxu1 %v1717_v48 }
  0x69   :  { %1222 = vmatprep.subr.bf16.mxu1 %v1534_v0  ;;  %v1060_v0 = vld [vmem:[%s1873_s4 + $0x4] sm:$0xf]  ;;  %s1776_s4 = smov 1  }
  0x6a   :  { %1218 = vmatpush3.bf16.msra.mxu0 %v1728_v58  ;;  %v235_v2 = vrot.slane %v1060_v0, %v216_v7  ;;  %v231_v4 = vrot.slane %v1060_v0, %v212_v8  ;;  %v227_v10 = vrot.slane %v1060_v0, %v208_v25  ;;  %v1759_v21 = vrot.slane %v1060_v0, %v204_v30 }
  0x6c   :  { %1224 = vmatpush3.bf16.msra.mxu1 %v1722_v56 }
  0x6f   :  { %1157 = vmatmul.mubr.msk.f32.vlgmr.msra.gmra.mrb[2].mxu1 %vm242_vm2, %v238_v50 }
  0xd5   :  { %v1698_v24 = vpop.permute.xlu0 %341  ;;  %v1714_v41 = vpop.permute.xlu1 %336 }
 0x137   :  { %v1125_v22 = vpop.f32.mrb[0].mxu0 }
 0x138   :  { %186 = vst.msk [vmem:[#allocation2 + $0x8] sm:$0xff] %vm184_vm3, %v1125_v22  ;;  %v175_v23 = vpop.f32.mrb[1].mxu0 }
 0x139   :  { %185 = vst.msk [vmem:[#allocation2] sm:$0xff] %vm184_vm3, %v175_v23 }
 0x13a   :  { %v312_v26 = vpop.f32.mrb[0].mxu1 }
 0x13b   :  { %v344_v27 = vadd.f32 %v1698_v24, %v312_v26  ;;  %v1136_v28 = vpop.f32.mrb[1].mxu1 }
 0x13d   :  { %346 = vrot.lane.b32.xlu0 %v344_v27, %s1537_s27 }
 0x140   :  { %v241_v31 = vld [vmem:[#allocation2] sm:$0x3] }
 0x141   :  { %325 = vrot.lane.b32.xlu0 %v209_v29, %s1526_s15  ;;  %v316_v33 = vadd.f32 %v312_v26, %v241_v31  ;;  %v339_v42 = vadd.f32 %v1714_v41, %v241_v31 }
 0x142   :  { %v511_v7 = vpop.f32.mrb[2].mxu1 }
 0x143   :  { %v317_v34 = vadd.f32 %v316_v33, %v1710_v32  ;;  %v1158_v8 = vpop.f32.mrb[3].mxu1 }
 0x145   :  { %362 = vrot.lane.b32.xlu0 %v236_v15, %s1526_s15  ;;  %v1062_v35 = vmul.f32 -1.442695, %v317_v34 }
 0x147   :  { %1297 = vpow2.f32 %v1062_v35 }
 0x149   :  { %540 = vrot.lane.b32.xlu0 %v235_v2, %s1537_s27 }
 0x14d   :  { %535 = vrot.lane.b32.xlu0 %v231_v4, %s1537_s27 }
 0x151   :  { %v1298_v36 = vpop.eup %1297  ;;  %524 = vrot.lane.b32.xlu0 %v227_v10, %s1526_s15 }
 0x152   :  { %v321_v37 = vadd.f32 1.0, %v1298_v36 }
 0x154   :  { %1299 = vrcp.f32 %v321_v37 }
 0x155   :  { %561 = vrot.lane.b32.xlu0 %v238_v50, %s1526_s15 }
 0x15e   :  { %v1300_v38 = vpop.eup %1299 }
 0x1af   :  { %v347_v39 = vpop.permute.xlu0 %346 }
 0x1b0   :  { %v349_v40 = vmul.f32 %v1300_v38, %v347_v39 }
 0x1b2   :  { %351 = vrot.lane.b32.xlu1 %v349_v40, %s1537_s27 }
 0x1b3   :  { %v1735_v60 = vpop.permute.xlu0 %325 }
 0x1b4   :  { %v328_v61 = vadd.f32 %v1735_v60, %v316_v33 }
 0x1b6   :  { %v1063_v62 = vmul.f32 -1.442695, %v328_v61 }
 0x1b7   :  { %v363_v6 = vpop.permute.xlu0 %362 }
 0x1bb   :  { %v1752_v17 = vpop.permute.xlu0 %540 }
 0x1bc   :  { %v543_v18 = vadd.f32 %v1752_v17, %v511_v7 }
 0x1bf   :  { %v1763_v35 = vpop.permute.xlu0 %535 }
 0x1c3   :  { %v1767_v38 = vpop.permute.xlu0 %524 }
 0x1c7   :  { %v562_v45 = vpop.permute.xlu0 %561 }
 0x224   :  { %v352_v43 = vpop.permute.xlu1 %351 }
 0x225   :  { %v354_v44 = vadd.f32 %v352_v43, %v339_v42 }
 0x227   :  { %1301 = vtanh.f32 %v354_v44 }
 0x228   :  { %1303 = vpow2.f32 %v1063_v62 }
 0x231   :  { %v1302_v59 = vpop.eup %1301 }
 0x232   :  { %358 = vrot.lane.b32.xlu1 %v1302_v59, %s1538_s29  ;;  %v1304_v63 = vpop.eup %1303 }
 0x233   :  { %v332_v1 = vadd.f32 1.0, %v1304_v63 }
 0x235   :  { %1305 = vrcp.f32 %v332_v1 }
 0x23f   :  { %v1306_v5 = vpop.eup %1305 }
 0x240   :  { %v356_v9 = vsub.f32 1.0, %v1306_v5  ;;  %v365_v13 = vmul.f32 %v1306_v5, %v363_v6 }
 0x2a4   :  { %v359_v11 = vpop.permute.xlu1 %358 }
 0x2a5   :  { %v361_v14 = vmul.f32 %v359_v11, %v356_v9 }
 0x2a7   :  { %v366_v15 = vadd.f32 %v365_v13, %v361_v14  }
 0x2a9   :  { %368 = vrot.lane.b32.xlu1 %v366_v15, %s1538_s29 }
 0x2ad   :  { %545 = vrot.lane.b32.xlu1 %v543_v18, %s1537_s27 }
 0x31b   :  { %v369_v20 = vpop.permute.xlu1 %368 }
 0x31c   :  { %1146 = vmatmul.mubr.msk.f32.vlgmr.msra.gmra.mrb[2].mxu0 %vm242_vm2, %v369_v20 }
 0x31f   :  { %v546_v31 = vpop.permute.xlu1 %545 }
 0x3ef   :  { %v438_v22 = vpop.f32.mrb[2].mxu0 }
 0x3f0   :  { %v515_v23 = vadd.f32 %v511_v7, %v438_v22  ;;  %v1147_v25 = vpop.f32.mrb[3].mxu0  ;;  %v538_v3 = vadd.f32 %v1763_v35, %v438_v22 }
 0x3f2   :  { %v516_v26 = vadd.f32 %v515_v23, %v1759_v21  ;;  %v527_v39 = vadd.f32 %v1767_v38, %v515_v23 }
 0x3f4   :  { %v1066_v27 = vmul.f32 -1.442695, %v516_v26  ;;  %v1067_v40 = vmul.f32 -1.442695, %v527_v39 }
 0x3f6   :  { %1307 = vpow2.f32 %v1066_v27 }
 0x400   :  { %v1308_v28 = vpop.eup %1307 }
 0x401   :  { %v520_v29 = vadd.f32 1.0, %v1308_v28 }
 0x403   :  { %1309 = vrcp.f32 %v520_v29 }
 0x40d   :  { %v1310_v33 = vpop.eup %1309 }
 0x40e   :  { %v548_v34 = vmul.f32 %v1310_v33, %v546_v31 }
 0x410   :  { %550 = vrot.lane.b32.xlu1 %v548_v34, %s1537_s27 }
 0x482   :  { %v551_v30 = vpop.permute.xlu1 %550 }
 0x483   :  { %v553_v36 = vadd.f32 %v551_v30, %v538_v3 }
 0x485   :  { %1311 = vtanh.f32 %v553_v36 }
 0x486   :  { %1313 = vpow2.f32 %v1067_v40 }
 0x48f   :  { %v1312_v37 = vpop.eup %1311 }
 0x490   :  { %557 = vrot.lane.b32.xlu1 %v1312_v37, %s1538_s29  ;;  %v1314_v42 = vpop.eup %1313 }
 0x491   :  { %v531_v43 = vadd.f32 1.0, %v1314_v42 }
 0x493   :  { %1315 = vrcp.f32 %v531_v43 }
 0x49d   :  { %v1316_v44 = vpop.eup %1315 }
 0x49e   :  { %v555_v46 = vsub.f32 1.0, %v1316_v44  ;;  %v564_v49 = vmul.f32 %v1316_v44, %v562_v45 }
 0x502   :  { %v558_v47 = vpop.permute.xlu1 %557 }
 0x503   :  { %v560_v50 = vmul.f32 %v558_v47, %v555_v46 }
 0x505   :  { %v565_v51 = vadd.f32 %v564_v49, %v560_v50  }
 0x507   :  { %567 = vrot.lane.b32.xlu1 %v565_v51, %s1538_s29 }
 0x579   :  { %v568_v53 = vpop.permute.xlu1 %567 }
 0x57a   :  { %571 = vst.msk [vmem:[#allocation3] sm:$0x3] %vm570_vm4, %v568_v53 }
 0x57b LB: > { %v1539_v54 = vmov 0.0|0.0   ;;  %vm1540_vm5 = vmmov 0   ;;  %v1541_v55 = vmov 0.0   ;;  %v580_v59 = vmul.f32 0.8, %v1519_v15  ;;  %s1542_s10 = smov 96   ;;  %s1523_s4 = sphi %s1776_s4, %s577_s4   ;;  %v1519_v15 = vphi %v366_v15, %v1879_v15   ;;  %v1515_v51 = vphi %v565_v51, %v1878_v51  }
 0x57c   : > { %1225 = vmatprep.subr.bf16.mxu0 %v1539_v54  ;;  %1167 = vmatprep.mubr.msk.f32.mxu0 %vm1540_vm5, %v1541_v55  ;;  %s1543_s11 = smov 64   ;;  %s1544_s12 = smov 32   ;;  %v586_v20 = vmul.f32 0.8, %v1515_v51 }
 0x57d   : > { %1227 = vmatpush3.bf16.msra.mxu0 %v1673_v12  ;;  %1231 = vmatprep.subr.bf16.mxu1 %v1539_v54  ;;  %s1068_s13 = sshll.u32 %s1523_s4, 1  ;;  %s577_s4 = sadd.s32 1, %s1523_s4  }
 0x57e   : > { %1228 = vmatprep.subr.bf16.mxu0 %v1539_v54  ;;  %1233 = vmatpush3.bf16.msra.mxu1 %v1724_v57  ;;  %s593_s0 = scalar_lea.vmem [#allocation2], %s1068_s13  ;;  %s898_s22 = scalar_lea.vmem [#allocation3], %s1068_s13 }
 0x57f   : > { %582 = vrot.lane.b32.xlu0 %v580_v59, %s1542_s10  ;;  %1234 = vmatprep.subr.bf16.mxu1 %v1539_v54  ;;  %v594_v2 = vld [vmem:[%s593_s0] sm:$0x3]  ;;  %p574_p12 = scmp.ge.s32.totalorder %s577_s4, 8  }
 0x580   : > { %1178 = vmatprep.mubr.msk.f32.mxu1 %vm1540_vm5, %v1541_v55  ;;  %v683_v15 = vadd.f32 %v594_v2, %v1714_v41  ;;  %s1545_s14 = smov (%p574_p12), [#allocation14]  }
 0x581   : > { %1230 = vmatpush3.bf16.msra.mxu0 %v1682_v19  ;;  %s1025_s17 = sshll.u32 (%p574_p12), %s1545_s14, 4  ;;  %s1026_s17 = int_to_ptr.vmem [resolvable:$true] %s1025_s17 }
 0x582   : > { %1237 = vmatprep.subr.bf16.mxu0 %v1539_v54  ;;  %1236 = vmatpush3.bf16.msra.mxu1 %v1728_v58  ;;  %s1447_s18 = scalar_lea.vmem (%p574_p12), %s1026_s17, 64  ;;  %p1452_p0 = scmp.lt.s32.totalorder (%p574_p12), %s1026_s17, %s1026_s17 }
 0x583   :  { %p1448_p13 = scmp.ne.s32.totalorder (%p574_p12), %s1026_s17, %s1447_s18  ;;  %p1453_p1 = scmp.lt.s32.totalorder (%p574_p12), %s1447_s18, %s1447_s18 }
 0x585   :  { %p1454_p2 = por (%p574_p12), %p1453_p1, %p1452_p0 }
 0x587   :  { %p1455_p3 = pnand (%p574_p12), %p1454_p2, %p1448_p13 }
 0x5f1   : > { %v583_v61 = vpop.permute.xlu0 %582 }
 0x5f2   : > { %v585_v62 = vadd.f32 %v583_v61, %v1676_v16 }
 0x5f4   : > { %1168 = vmatmul.mubr.msk.f32.vlgmr.msra.gmra.mrb[0].mxu0 %vm242_vm2, %v585_v62 }
 0x5f5   : > { %1239 = vmatpush3.bf16.msra.mxu0 %v1717_v48  ;;  %1189 = vmatprep.mubr.msk.f32.mxu0 %vm1540_vm5, %v1541_v55 }
 0x5f6   : > { %1240 = vmatprep.subr.bf16.mxu0 %v1539_v54 }
 0x5f9   : > { %1242 = vmatpush3.bf16.msra.mxu0 %v1722_v56 }
 0x6c7   : > { %v664_v63 = vpop.f32.mrb[0].mxu0 }
 0x6c8   : > { %v684_v1 = vadd.f32 %v664_v63, %v1698_v24  ;;  %v1169_v0 = vpop.f32.mrb[1].mxu0  ;;  %v668_v4 = vadd.f32 %v664_v63, %v594_v2 }
 0x6ca   : > { %686 = vrot.lane.b32.xlu0 %v684_v1, %s1543_s11  ;;  %v669_v5 = vadd.f32 %v668_v4, %v1710_v32  ;;  %v676_v22 = vadd.f32 %v668_v4, %v1735_v60 }
 0x6cc   : > { %v1070_v6 = vmul.f32 -1.442695, %v669_v5  ;;  %v1071_v23 = vmul.f32 -1.442695, %v676_v22 }
 0x6ce   : > { %702 = vrot.lane.b32.xlu0 %v585_v62, %s1544_s12  ;;  %1317 = vpow2.f32 %v1070_v6 }
 0x6d8   : > { %v1318_v9 = vpop.eup %1317 }
 0x6d9   : > { %v673_v10 = vadd.f32 1.0, %v1318_v9 }
 0x6db   : > { %1319 = vrcp.f32 %v673_v10 }
 0x6e5   : > { %v1320_v11 = vpop.eup %1319 }
 0x73c   : > { %v687_v13 = vpop.permute.xlu0 %686 }
 0x73d   : > { %v689_v14 = vmul.f32 %v1320_v11, %v687_v13 }
 0x73f   : > { %691 = vrot.lane.b32.xlu1 %v689_v14, %s1543_s11 }
 0x740   : > { %v703_v28 = vpop.permute.xlu0 %702 }
 0x7b1   : > { %v692_v7 = vpop.permute.xlu1 %691 }
 0x7b2   : > { %v694_v8 = vadd.f32 %v692_v7, %v683_v15  ;;  %v914_v7 = vld [vmem:[#allocation12 + $0x8] sm:$0xff] (%p574_p12) }
 0x7b4   : > { %1321 = vtanh.f32 %v694_v8  ;;  %v915_v8 = vld [vmem:[#allocation12 + $0x10] sm:$0xff] (%p574_p12) }
 0x7b5   : > { %1323 = vpow2.f32 %v1071_v23 }
 0x7be   : > { %v1322_v18 = vpop.eup %1321 }
 0x7bf   : > { %698 = vrot.lane.b32.xlu1 %v1322_v18, %s1542_s10  ;;  %v1324_v25 = vpop.eup %1323 }
 0x7c0   : > { %v680_v26 = vadd.f32 1.0, %v1324_v25 }
 0x7c2   : > { %1325 = vrcp.f32 %v680_v26 }
 0x7c3   : > { %588 = vrot.lane.b32.xlu1 %v586_v20, %s1542_s10  ;;  %v916_v20 = vld [vmem:[#allocation12 + $0x18] sm:$0xff] (%p574_p12) }
 0x7c4   :  { %v1247_v23 = vpack.c.bf16 (%p574_p12), %v916_v20, %v915_v8 }
 0x7cc   : > { %v1326_v27 = vpop.eup %1325 }
 0x7cd   : > { %v696_v29 = vsub.f32 1.0, %v1326_v27  ;;  %v705_v33 = vmul.f32 %v1326_v27, %v703_v28 }
 0x831   : > { %v699_v31 = vpop.permute.xlu1 %698 }
 0x832   : > { %v701_v34 = vmul.f32 %v699_v31, %v696_v29 }
 0x834   : > { %v706_v3 = vadd.f32 %v705_v33, %v701_v34  }
 0x835   : > { %v589_v30 = vpop.permute.xlu1 %588 }
 0x836   : > { %708 = vrot.lane.b32.xlu0 %v706_v3, %s1542_s10  ;;  %v591_v36 = vadd.f32 %v589_v30, %v1719_v52  ;;  %v1879_v15 = vmov %v706_v3 }
 0x837   :  { %v913_v15 = vld [vmem:[#allocation12] sm:$0xff] (%p574_p12) }
 0x838   : > { %1190 = vmatmul.mubr.msk.f32.vlgmr.msra.gmra.mrb[2].mxu0 %vm242_vm2, %v591_v36  ;;  %v1243_v18 = vpack.c.bf16 (%p574_p12), %v914_v7, %v913_v15 }
 0x83a   :  { %1244 = vmatprep.subr.bf16.mxu0 (%p574_p12), %v1243_v18 }
 0x83b   :  { %1246 = vmatpush3.bf16.msra.mxu0 (%p574_p12), %v1243_v18 }
 0x83c   :  { %1248 = vmatprep.subr.bf16.mxu0 (%p574_p12), %v1247_v23 }
 0x83f   :  { %1250 = vmatpush3.bf16.msra.mxu0 (%p574_p12), %v1247_v23 }
 0x8a8   : > { %v709_v37 = vpop.permute.xlu0 %708 }
 0x8a9   : > { %1179 = vmatmul.mubr.msk.f32.vlgmr.msra.gmra.mrb[0].mxu1 %vm242_vm2, %v709_v37 }
 0x90b   : > { %v851_v39 = vpop.f32.mrb[2].mxu0 }
 0x90c   : > { %v871_v40 = vadd.f32 %v851_v39, %v1752_v17  ;;  %v1191_v42 = vpop.f32.mrb[3].mxu0 }
 0x90e   : > { %873 = vrot.lane.b32.xlu1 %v871_v40, %s1543_s11 }
 0x97c   : > { %v778_v43 = vpop.f32.mrb[0].mxu1 }
 0x97d   : > { %v855_v44 = vadd.f32 %v851_v39, %v778_v43  ;;  %v1180_v45 = vpop.f32.mrb[1].mxu1  ;;  %v870_v55 = vadd.f32 %v778_v43, %v1763_v35 }
 0x97f   : > { %v856_v46 = vadd.f32 %v855_v44, %v1759_v21  ;;  %v863_v63 = vadd.f32 %v855_v44, %v1767_v38 }
 0x980   : > { %v874_v51 = vpop.permute.xlu1 %873 }
 0x981   : > { %v1074_v47 = vmul.f32 -1.442695, %v856_v46  ;;  %v1075_v1 = vmul.f32 -1.442695, %v863_v63 }
 0x983   : > { %1327 = vpow2.f32 %v1074_v47 }
 0x98d   : > { %v1328_v49 = vpop.eup %1327 }
 0x98e   : > { %v860_v50 = vadd.f32 1.0, %v1328_v49 }
 0x990   : > { %1329 = vrcp.f32 %v860_v50 }
 0x99a   : > { %v1330_v53 = vpop.eup %1329 }
 0x99b   : > { %v876_v54 = vmul.f32 %v1330_v53, %v874_v51 }
 0x99d   : > { %878 = vrot.lane.b32.xlu0 %v876_v54, %s1543_s11 }
 0x9a1   : > { %889 = vrot.lane.b32.xlu0 %v591_v36, %s1544_s12 }
 0x9a5   :  { %901 = vrot.lane.b32.xlu0 (%p574_p12), %v706_v3, %s1538_s29 }
 0xa0f   : > { %v879_v59 = vpop.permute.xlu0 %878 }
 0xa10   : > { %v881_v61 = vadd.f32 %v879_v59, %v870_v55 }
 0xa12   : > { %1331 = vtanh.f32 %v881_v61 }
 0xa13   : > { %1333 = vpow2.f32 %v1075_v1  ;;  %v890_v5 = vpop.permute.xlu0 %889 }
 0xa17   :  { %v902_v12 = vpop.permute.xlu0 (%p574_p12), %901 }
 0xa18   :  { %904 = vst.msk [vmem:[#allocation14] sm:$0x3] (%p574_p12), %vm570_vm4, %v902_v12 }
 0xa1c   : > { %v1332_v62 = vpop.eup %1331 }
 0xa1d   : > { %885 = vrot.lane.b32.xlu1 %v1332_v62, %s1542_s10  ;;  %v1334_v0 = vpop.eup %1333 }
 0xa1e   : > { %v867_v2 = vadd.f32 1.0, %v1334_v0 }
 0xa20   : > { %1335 = vrcp.f32 %v867_v2 }
 0xa2a   : > { %v1336_v4 = vpop.eup %1335 }
 0xa2b   : > { %v883_v6 = vsub.f32 1.0, %v1336_v4  ;;  %v892_v10 = vmul.f32 %v1336_v4, %v890_v5 }
 0xa8f   : > { %v886_v9 = vpop.permute.xlu1 %885 }
 0xa90   : > { %v888_v11 = vmul.f32 %v886_v9, %v883_v6 }
 0xa92   : > { %v893_v13 = vadd.f32 %v892_v10, %v888_v11  }
 0xa94   : > { %895 = vrot.lane.b32.xlu1 %v893_v13, %s1542_s10  ;;  %v1878_v51 = vmov %v893_v13  ;;  %906 = vrot.lane.b32.xlu0 (%p574_p12), %v893_v13, %s1538_s29 }
 0xb01   :  { %576 = sbr.rel (!%p574_p12) target bundleno = 1403 (0x57b), region = 90 }
 0xb06   : > { %v896_v14 = vpop.permute.xlu1 %895  ;;  %v907_v16 = vpop.permute.xlu0 (%p574_p12), %906 }
 0xb07   : > { %899 = vst.msk [vmem:[%s898_s22] sm:$0x3] %vm570_vm4, %v896_v14  ;;  %910 = vst.msk [vmem:[#allocation14 + $0x2] sm:$0x3] (%p574_p12), %vm570_vm4, %v907_v16 }
 0xb0e   :  { %v911_v22 = vld [vmem:[#allocation3] sm:$0xff]  ;;  %v912_v25 = vld [vmem:[#allocation3 + $0x8] sm:$0xff] }
 0xb0f   :  { %1200 = vmatprep.mubr.msk.f32.mxu0 %vm242_vm2, %v911_v22 }
 0xb10   :  { %1201 = vmatmul.mubr.msk.f32.vlgmr.msra.gmra.mrb[0].mxu0 %vm242_vm2, %v912_v25 }
 0xb11   :  { %1458 = shalt.err (!%p1455_p3)
}
 0xb12   :  { %s1459_s23 = scalar_lea.hbm %s1877_s8, 64 }
 0xb13   :  { %p1460_p4 = scmp.ne.s32.totalorder %s1877_s8, %s1459_s23  ;;  %p1463_p5 = scmp.lt.u32.totalorder %s1459_s23, %s1877_s8 }
 0xb15   :  { %p1465_p6 = pnand %p1463_p5, %p1460_p4 }
 0xb17   :  { %1468 = shalt.err (!%p1465_p6)
}
 0xb18   :  { %1031 = dma.vmem_to_hbm [thread:$0]  %s1026_s17, 64, %s1877_s8, [#allocation15], %s1526_s15, %s1526_s15, %s1527_s16   ;;  %vm1005_vm6 = vcmask 392192  }
 0xb19   :  { %v1076_v19 = vld [vmem:[%s1875_s6] ss:$0 sm:$0xff]  ;;  %s1546_s29 = smov [#allocation13]  }
 0xb1a   :  { %s1013_s30 = sshll.u32 %s1546_s29, 4  ;;  %s1014_s30 = int_to_ptr.vmem [resolvable:$true] %s1013_s30 }
 0xb1b   :  { %s1469_s1 = scalar_lea.vmem %s1014_s30, 256  ;;  %p1474_p8 = scmp.lt.s32.totalorder %s1014_s30, %s1014_s30 }
 0xb1c   :  { %p1470_p7 = scmp.ne.s32.totalorder %s1014_s30, %s1469_s1  ;;  %p1475_p9 = scmp.lt.s32.totalorder %s1469_s1, %s1469_s1 }
 0xb1e   :  { %p1476_p10 = por %p1475_p9, %p1474_p8 }
 0xb20   :  { %p1477_p11 = pnand %p1476_p10, %p1470_p7 }
 0xbe3   :  { %v1202_v24 = vpop.f32.mrb[0].mxu0 }
 0xbe4   :  { %v1002_v32 = vadd.f32 %v1202_v24, %v1076_v19  ;;  %v996_v41 = vpop.f32.mrb[1].mxu0 }
 0xbe5   :  { %v997_v48 = vadd.f32 %v1076_v19, %v996_v41 }
 0xbe6   :  { %1007 = vst.msk [vmem:[#allocation13 + $0x8] sm:$0xff] %vm1005_vm6, %v1002_v32 }
 0xbe7   :  { %1006 = vst.msk [vmem:[#allocation13] sm:$0xff] %vm1005_vm6, %v997_v48 }
 0xbe8   :  { %1480 = shalt.err (!%p1477_p11)
}
 0xbe9   :  { %s1481_s6 = scalar_lea.hbm %s1876_s7, 256 }
 0xbea   :  { %p1482_p12 = scmp.ne.s32.totalorder %s1876_s7, %s1481_s6  ;;  %p1485_p13 = scmp.lt.u32.totalorder %s1481_s6, %s1876_s7 }
 0xbec   :  { %p1487_p0 = pnand %p1485_p13, %p1482_p12 }
 0xbee   :  { %1490 = shalt.err (!%p1487_p0)
}
 0xbef   :  { %1019 = dma.vmem_to_hbm [thread:$0]  %s1014_s30, 256, %s1876_s7, [#allocation6], %s1530_s28, %s1530_s28, %s1531_s9  }
 0xbf0   :  { %1509 = dma.done.wait [#allocation6], 256  }
 0xbf1   :  { %1510 = vsyncadd [#allocation6], 4294967040 }
 0xbf2   :  { %1511 = dma.done.wait [#allocation15], 64  }
 0xbf3   :  { %1512 = vsyncadd [#allocation15], 4294967232 }
 0xbf4   :  { %1038 = vsyncpa [#allocation5], 1 }
 0xbf5   :  { %1039 = vsyncpa [#allocation8], 1 }
 0xbf6   :  { %1040 = vsyncpa [#allocation11], 1 }
 0xbf7   :  { %1041 = vsyncpa [#allocation6], 1 }
 0xbf8   :  { %1042 = vsyncpa [#allocation15], 1 }

</bundles_post_ra>
